<compile_context>
chip_gen: v7x
topology: tpu7x:2x2x1
jax: 0.10.0
libtpu: 0.0.40
codegen_flags: <defaults>
</compile_context>

<pallas_src>
import jax
import jax.numpy as jnp
from jax.experimental import pallas as pl
from jax.experimental.pallas import tpu as pltpu


def _make_kernel(seq_len, ts, needs_mask):
    """Online-softmax attention-pooling kernel over (batch, seq) grid."""

    def kernel(x_ref, w_ref, o_ref, m_sc, l_sc, acc_sc):
        # x_ref: (tb, ts, H) block in the input dtype (f32 or bf16)
        # w_ref: (H, 1) resident attention weight (same dtype as x)
        # o_ref: (tb, H) output block, resident across the sequence grid axis
        # m_sc/l_sc: (tb, 1, 1) f32 running max / denom; acc_sc: (tb, 1, H) f32
        j = pl.program_id(1)

        @pl.when(j == 0)
        def _init():
            m_sc[...] = jnp.full_like(m_sc, -jnp.inf)
            l_sc[...] = jnp.zeros_like(l_sc)
            acc_sc[...] = jnp.zeros_like(acc_sc)

        x = x_ref[...]                                           # (tb, ts, H)
        w = w_ref[...]                                           # (H, 1)

        # logits[t, s] = sum_h x[t, s, h] * w[h]  -- MXU, f32 accumulation.
        logits = jnp.einsum("tsh,hk->tsk", x, w,
                            preferred_element_type=jnp.float32)  # (tb, ts, 1)

        if needs_mask:
            # Padded sequence positions (only present when S was padded to a
            # multiple of ts) must not contribute to the softmax.
            pos = j * ts + jax.lax.broadcasted_iota(jnp.int32, logits.shape, 1)
            logits = jnp.where(pos < seq_len, logits, -jnp.inf)

        # Online (streaming) numerically-stable softmax over the sequence axis.
        m_prev = m_sc[...]                                       # (tb, 1, 1)
        m_cur = jnp.max(logits, axis=1, keepdims=True)           # (tb, 1, 1)
        m_new = jnp.maximum(m_prev, m_cur)
        alpha = jnp.exp(m_prev - m_new)                          # rescale factor
        e = jnp.exp(logits - m_new)                              # (tb, ts, 1) f32

        l_sc[...] = alpha * l_sc[...] + jnp.sum(e, axis=1, keepdims=True)
        # Unnormalized weighted sum over this S chunk -- batched (1, ts) x
        # (ts, H) on the MXU (e cast to x.dtype keeps bf16 single-pass MXU;
        # accumulation stays f32 via preferred_element_type).
        part = jnp.einsum("tsk,tsh->tkh", e.astype(x.dtype), x,
                          preferred_element_type=jnp.float32)    # (tb, 1, H)
        acc_sc[...] = alpha * acc_sc[...] + part
        m_sc[...] = m_new

        @pl.when(j == pl.num_programs(1) - 1)
        def _finalize():
            inv = pl.reciprocal(l_sc[...], approx=True)          # (tb, 1, 1)
            o_ref[...] = (acc_sc[...] * inv).reshape(o_ref.shape).astype(o_ref.dtype)

    return kernel


def attention_weighted_average(x, w, b=None, *,
                               max_block_bytes=12 * 1024 * 1024,
                               vmem_limit_bytes=48 * 1024 * 1024):
    """x: (B, S, H), w: (H,), b: () or None  ->  (B, H) in x.dtype.

    The Linear bias cancels inside the softmax (softmax(l + b) == softmax(l)),
    so it is intentionally unused -- zero numerical change.
    x is streamed in its native dtype (pass bf16 to halve HBM traffic);
    accumulation and softmax statistics are always f32.
    """
    del b  # softmax shift-invariance
    B, S, H = x.shape
    dtype = x.dtype
    itemsize = jnp.dtype(dtype).itemsize
    w2 = w.reshape(H, 1).astype(dtype)

    # ---- tile selection -------------------------------------------------
    slab_bytes = S * H * itemsize                      # one full batch row
    fit_rows = max_block_bytes // max(slab_bytes, 1)

    if fit_rows < 8 and fit_rows < B:
        # A sublane-aligned block of >= 8 whole (S, H) slabs would blow the
        # VMEM budget -> tile the sequence axis and accumulate online.
        tb = B if B < 8 else 8
        ts = max(8, ((max_block_bytes // (tb * H * itemsize)) // 8) * 8)
        ts = min(ts, ((S + 7) // 8) * 8)
    else:
        # Whole (S, H) slabs fit; tile only the batch axis.
        ts = S
        tb = min(B, fit_rows)
        if B >= 16:
            # Ensure >= 2 grid steps so both TensorCores (v7x megacore) get
            # work and the pipeline has something to overlap.
            tb = min(tb, -(-B // 2))
        if tb < B:
            tb = max(8, (tb // 8) * 8)     # sublane-aligned output block

    b_pad = B if tb == B else ((B + tb - 1) // tb) * tb
    s_pad = S if ts == S else ((S + ts - 1) // ts) * ts
    needs_mask = s_pad != S

    if b_pad != B or s_pad != S:
        # Zero batch-padding rows give zero output (sliced off below); padded
        # sequence positions are masked inside the kernel.
        x = jnp.pad(x, ((0, b_pad - B), (0, s_pad - S), (0, 0)))

    block_bytes = tb * ts * H * itemsize
    vmem_limit_bytes = max(vmem_limit_bytes, 2 * block_bytes + (4 << 20))

    out = pl.pallas_call(
        _make_kernel(S, ts, needs_mask),
        out_shape=jax.ShapeDtypeStruct((b_pad, H), dtype),
        grid_spec=pltpu.PrefetchScalarGridSpec(
            num_scalar_prefetch=0,
            grid=(b_pad // tb, s_pad // ts),          # reduction (S) axis last
            in_specs=[
                pl.BlockSpec((tb, ts, H), lambda i, j: (i, j, 0)),
                pl.BlockSpec((H, 1), lambda i, j: (0, 0)),   # resident weight
            ],
            out_specs=pl.BlockSpec((tb, H), lambda i, j: (i, 0)),
            scratch_shapes=[
                pltpu.VMEM((tb, 1, 1), jnp.float32),   # running max
                pltpu.VMEM((tb, 1, 1), jnp.float32),   # running denom
                pltpu.VMEM((tb, 1, H), jnp.float32),   # running weighted sum
            ],
        ),
        compiler_params=pltpu.CompilerParams(
            dimension_semantics=("parallel", "arbitrary"),
            vmem_limit_bytes=vmem_limit_bytes,
        ),
    )(x, w2)
    return out[:B]


def _reference(x, w, b):
    xf = x.astype(jnp.float32)
    logits = jnp.einsum("bsh,h->bs", xf, w.astype(jnp.float32)) + b   # (B, S)
    weights = jax.nn.softmax(logits, axis=1)[..., None]               # (B, S, 1)
    return jnp.sum(xf * weights, axis=1)                              # (B, H)


if __name__ == "__main__":
    key = jax.random.PRNGKey(0)
    kx, kw, kb, kx2, kw2 = jax.random.split(key, 5)

    # Shapes implied by the module forward: (batch, seq, hidden).
    B, S, H = 2, 8, 32
    x = jax.random.normal(kx, (B, S, H), dtype=jnp.float32)
    w = jax.random.normal(kw, (H,), dtype=jnp.float32) * 0.1   # Linear(H, 1).weight
    b = jax.random.normal(kb, (), dtype=jnp.float32) * 0.1     # Linear(H, 1).bias

    ref = jax.block_until_ready(_reference(x, w, b))

    # 1) f32 streaming path (single block, whole sequence in VMEM).
    out = jax.block_until_ready(attention_weighted_average(x, w, b))
    assert out.shape == (B, H)
    assert jnp.allclose(out, ref, atol=5e-3, rtol=5e-3), "f32 path mismatch"

    # 2) bf16 streaming path (halves HBM bytes; f32 accumulation in-kernel).
    out_bf16 = jax.block_until_ready(
        attention_weighted_average(x.astype(jnp.bfloat16), w, b))
    assert out_bf16.dtype == jnp.bfloat16
    assert jnp.allclose(out_bf16.astype(jnp.float32), ref, atol=5e-2, rtol=5e-2), \
        "bf16 path mismatch"

    # 3) Sequence-tiled online-softmax path (forced via a tiny block budget),
    #    exercising the VMEM-hazard fix and padded-sequence masking.
    B2, S2, H2 = 4, 40, 128
    x2 = jax.random.normal(kx2, (B2, S2, H2), dtype=jnp.float32)
    w2 = jax.random.normal(kw2, (H2,), dtype=jnp.float32) * 0.1
    ref2 = jax.block_until_ready(_reference(x2, w2, 0.0))
    out2 = jax.block_until_ready(
        attention_weighted_average(x2, w2, None, max_block_bytes=40 * 1024))
    assert out2.shape == (B2, H2)
    assert jnp.allclose(out2, ref2, atol=1e-2, rtol=1e-2), "tiled-S path mismatch"

    print("KERNEL_OK")
</pallas_src>

<mosaic_0001>
module attributes {stable_mosaic.version = 11 : i64} {
  func.func @kernel(%arg0: i32, %arg1: i32, %arg2: memref<2x8x32xf32, #tpu.memory_space<vmem>>, %arg3: memref<32x1xf32, #tpu.memory_space<vmem>>, %arg4: memref<2x32xf32, #tpu.memory_space<vmem>>, %arg5: memref<2x1x1xf32, #tpu.memory_space<vmem>>, %arg6: memref<2x1x1xf32, #tpu.memory_space<vmem>>, %arg7: memref<2x1x32xf32, #tpu.memory_space<vmem>>) attributes {dimension_semantics = [#tpu.dimension_semantics<parallel>, #tpu.dimension_semantics<arbitrary>], iteration_bounds = array<i64: 1, 1>, scalar_prefetch = 0 : i64, scratch_operands = 3 : i64, tpu.core_type = #tpu.core_type<tc>, window_params = [{transform_indices = @transform_0, window_bounds = array<i64: 2, 8, 32>}, {pipeline_mode = #tpu.pipeline_mode<synchronous>, transform_indices = @transform_1, window_bounds = array<i64: 32, 1>}, {transform_indices = @transform_2, window_bounds = array<i64: 2, 32>}]} {
    %c0_i32 = arith.constant 0 : i32
    %0 = arith.cmpi eq, %arg1, %c0_i32 : i32
    %1 = arith.extui %0 : i1 to i32
    %c0_i32_0 = arith.constant 0 : i32
    %2 = arith.cmpi ne, %1, %c0_i32_0 : i32
    scf.if %2 {
      %cst_28 = arith.constant 0xFF800000 : f32
      %31 = vector.broadcast %cst_28 : f32 to vector<2x1x1xf32>
      %c0_29 = arith.constant 0 : index
      %c0_30 = arith.constant 0 : index
      %c0_31 = arith.constant 0 : index
      %32 = vector.load %arg5[%c0_29, %c0_30, %c0_31] : memref<2x1x1xf32, #tpu.memory_space<vmem>>, vector<2x1x1xf32>
      tpu.vector_store %arg5[%c0_29, %c0_30, %c0_31], %31 {strides = array<i32>} : memref<2x1x1xf32, #tpu.memory_space<vmem>>, vector<2x1x1xf32>,
      %cst_32 = arith.constant 0.000000e+00 : f32
      %33 = vector.broadcast %cst_32 : f32 to vector<2x1x1xf32>
      %c0_33 = arith.constant 0 : index
      %c0_34 = arith.constant 0 : index
      %c0_35 = arith.constant 0 : index
      %34 = vector.load %arg6[%c0_33, %c0_34, %c0_35] : memref<2x1x1xf32, #tpu.memory_space<vmem>>, vector<2x1x1xf32>
      tpu.vector_store %arg6[%c0_33, %c0_34, %c0_35], %33 {strides = array<i32>} : memref<2x1x1xf32, #tpu.memory_space<vmem>>, vector<2x1x1xf32>,
      %cst_36 = arith.constant 0.000000e+00 : f32
      %35 = vector.broadcast %cst_36 : f32 to vector<2x1x32xf32>
      %c0_37 = arith.constant 0 : index
      %c0_38 = arith.constant 0 : index
      %c0_39 = arith.constant 0 : index
      %36 = vector.load %arg7[%c0_37, %c0_38, %c0_39] : memref<2x1x32xf32, #tpu.memory_space<vmem>>, vector<2x1x32xf32>
      tpu.vector_store %arg7[%c0_37, %c0_38, %c0_39], %35 {strides = array<i32>} : memref<2x1x32xf32, #tpu.memory_space<vmem>>, vector<2x1x32xf32>,
    } else {
    }
    %c0 = arith.constant 0 : index
    %c0_1 = arith.constant 0 : index
    %c0_2 = arith.constant 0 : index
    %3 = vector.load %arg2[%c0, %c0_1, %c0_2] : memref<2x8x32xf32, #tpu.memory_space<vmem>>, vector<2x8x32xf32>
    %c0_3 = arith.constant 0 : index
    %c0_4 = arith.constant 0 : index
    %4 = vector.load %arg3[%c0_3, %c0_4] : memref<32x1xf32, #tpu.memory_space<vmem>>, vector<32x1xf32>
    "tpu.trace_start"() <{level = 10 : i32, message = "tsh,hk->tsk"}> : () -> ()
    %cst = arith.constant dense<0.000000e+00> : vector<2x8x1xf32>
    %5 = tpu.matmul %3, %4, %cst {dimension_numbers = #tpu.dot_dimension_numbers<[2], [0], [0, 1], [1], [0, 0, 0, 1, 1, 1], [], []>} : vector<2x8x32xf32>, vector<32x1xf32>, vector<2x8x1xf32> -> vector<2x8x1xf32>
    "tpu.trace_stop"() : () -> ()
    %c0_5 = arith.constant 0 : index
    %c0_6 = arith.constant 0 : index
    %c0_7 = arith.constant 0 : index
    %6 = vector.load %arg5[%c0_5, %c0_6, %c0_7] : memref<2x1x1xf32, #tpu.memory_space<vmem>>, vector<2x1x1xf32>
    %cst_8 = arith.constant dense<0xFF800000> : vector<2x1xf32>
    %7 = vector.multi_reduction <maximumf>, %5, %cst_8 [1] : vector<2x8x1xf32> to vector<2x1xf32>
    %8 = vector.shape_cast %7 : vector<2x1xf32> to vector<2x1x1xf32>
    %9 = arith.maximumf %6, %8 : vector<2x1x1xf32>
    %10 = arith.subf %6, %9 : vector<2x1x1xf32>
    %11 = math.exp %10 : vector<2x1x1xf32>
    %12 = vector.broadcast %9 : vector<2x1x1xf32> to vector<2x8x1xf32>
    %13 = arith.subf %5, %12 : vector<2x8x1xf32>
    %14 = math.exp %13 : vector<2x8x1xf32>
    %c0_9 = arith.constant 0 : index
    %c0_10 = arith.constant 0 : index
    %c0_11 = arith.constant 0 : index
    %15 = vector.load %arg6[%c0_9, %c0_10, %c0_11] : memref<2x1x1xf32, #tpu.memory_space<vmem>>, vector<2x1x1xf32>
    %16 = arith.mulf %11, %15 : vector<2x1x1xf32>
    %cst_12 = arith.constant dense<0.000000e+00> : vector<2x1xf32>
    %17 = vector.multi_reduction <add>, %14, %cst_12 [1] : vector<2x8x1xf32> to vector<2x1xf32>
    %18 = vector.shape_cast %17 : vector<2x1xf32> to vector<2x1x1xf32>
    %19 = arith.addf %16, %18 : vector<2x1x1xf32>
    %c0_13 = arith.constant 0 : index
    %c0_14 = arith.constant 0 : index
    %c0_15 = arith.constant 0 : index
    %20 = vector.load %arg6[%c0_13, %c0_14, %c0_15] : memref<2x1x1xf32, #tpu.memory_space<vmem>>, vector<2x1x1xf32>
    tpu.vector_store %arg6[%c0_13, %c0_14, %c0_15], %19 {strides = array<i32>} : memref<2x1x1xf32, #tpu.memory_space<vmem>>, vector<2x1x1xf32>,
    "tpu.trace_start"() <{level = 10 : i32, message = "tsk,tsh->tkh"}> : () -> ()
    %cst_16 = arith.constant dense<0.000000e+00> : vector<2x1x32xf32>
    %21 = tpu.matmul %14, %3, %cst_16 {dimension_numbers = #tpu.dot_dimension_numbers<[1], [1], [2], [2], [0, 0, 0, 2, 1, 2], [0], [0]>} : vector<2x8x1xf32>, vector<2x8x32xf32>, vector<2x1x32xf32> -> vector<2x1x32xf32>
    "tpu.trace_stop"() : () -> ()
    %c0_17 = arith.constant 0 : index
    %c0_18 = arith.constant 0 : index
    %c0_19 = arith.constant 0 : index
    %22 = vector.load %arg7[%c0_17, %c0_18, %c0_19] : memref<2x1x32xf32, #tpu.memory_space<vmem>>, vector<2x1x32xf32>
    %23 = vector.broadcast %11 : vector<2x1x1xf32> to vector<2x1x32xf32>
    %24 = arith.mulf %23, %22 : vector<2x1x32xf32>
    %25 = arith.addf %24, %21 : vector<2x1x32xf32>
    %c0_20 = arith.constant 0 : index
    %c0_21 = arith.constant 0 : index
    %c0_22 = arith.constant 0 : index
    %26 = vector.load %arg7[%c0_20, %c0_21, %c0_22] : memref<2x1x32xf32, #tpu.memory_space<vmem>>, vector<2x1x32xf32>
    tpu.vector_store %arg7[%c0_20, %c0_21, %c0_22], %25 {strides = array<i32>} : memref<2x1x32xf32, #tpu.memory_space<vmem>>, vector<2x1x32xf32>,
    %c0_23 = arith.constant 0 : index
    %c0_24 = arith.constant 0 : index
    %c0_25 = arith.constant 0 : index
    %27 = vector.load %arg5[%c0_23, %c0_24, %c0_25] : memref<2x1x1xf32, #tpu.memory_space<vmem>>, vector<2x1x1xf32>
    tpu.vector_store %arg5[%c0_23, %c0_24, %c0_25], %9 {strides = array<i32>} : memref<2x1x1xf32, #tpu.memory_space<vmem>>, vector<2x1x1xf32>,
    %c0_i32_26 = arith.constant 0 : i32
    %28 = arith.cmpi eq, %arg1, %c0_i32_26 : i32
    %29 = arith.extui %28 : i1 to i32
    %c0_i32_27 = arith.constant 0 : i32
    %30 = arith.cmpi ne, %29, %c0_i32_27 : i32
    scf.if %30 {
      %c0_28 = arith.constant 0 : index
      %c0_29 = arith.constant 0 : index
      %c0_30 = arith.constant 0 : index
      %31 = vector.load %arg6[%c0_28, %c0_29, %c0_30] : memref<2x1x1xf32, #tpu.memory_space<vmem>>, vector<2x1x1xf32>
      %32 = tpu.reciprocal %31 {approx = true} : vector<2x1x1xf32> -> vector<2x1x1xf32>
      %c0_31 = arith.constant 0 : index
      %c0_32 = arith.constant 0 : index
      %c0_33 = arith.constant 0 : index
      %33 = vector.load %arg7[%c0_31, %c0_32, %c0_33] : memref<2x1x32xf32, #tpu.memory_space<vmem>>, vector<2x1x32xf32>
      %34 = vector.broadcast %32 : vector<2x1x1xf32> to vector<2x1x32xf32>
      %35 = arith.mulf %33, %34 : vector<2x1x32xf32>
      %36 = vector.shape_cast %35 : vector<2x1x32xf32> to vector<2x32xf32>
      %c0_34 = arith.constant 0 : index
      %c0_35 = arith.constant 0 : index
      %37 = vector.load %arg4[%c0_34, %c0_35] : memref<2x32xf32, #tpu.memory_space<vmem>>, vector<2x32xf32>
      tpu.vector_store %arg4[%c0_34, %c0_35], %36 {strides = array<i32>} : memref<2x32xf32, #tpu.memory_space<vmem>>, vector<2x32xf32>,
    } else {
    }
    return
  }
  func.func @transform_0(%arg0: i32, %arg1: i32) -> (i32, i32, i32) {
    %c0_i32 = arith.constant 0 : i32
    %c0_i32_0 = arith.constant 0 : i32
    return %arg0, %arg1, %c0_i32 : i32, i32, i32
  }
  func.func @transform_1(%arg0: i32, %arg1: i32) -> (i32, i32) {
    %c0_i32 = arith.constant 0 : i32
    %c0_i32_0 = arith.constant 0 : i32
    %c0_i32_1 = arith.constant 0 : i32
    return %c0_i32, %c0_i32_0 : i32, i32
  }
  func.func @transform_2(%arg0: i32, %arg1: i32) -> (i32, i32) {
    %c0_i32 = arith.constant 0 : i32
    %c0_i32_0 = arith.constant 0 : i32
    return %arg0, %c0_i32 : i32, i32
  }
}

</mosaic_0001>

<bundles_post_ra>
// kernel: tpu_custom_call.1
= control target key start
LH: loop header
LB: loop body
LE: loop exit
PB: predicated region body
PF: predicated region fallthrough
CT: control target
= control target key end

     0   :  { %vm30_vm0 = vcmask 261120   ;;  %vm16_vm1 = vcmask 0   ;;  %v568_v6 = vmov -inf   ;;  %v569_v8 = vmov 0.0   ;;  %s665_s0 = inlined_call_operand.vmem [shape: f32[2,8,32], index: 0, kind: input, shape index: {}]   ;;  %s666_s1 = inlined_call_operand.vmem [shape: f32[32,1], index: 1, kind: input, shape index: {}]   ;;  %s667_s2 = inlined_call_operand.hbm [shape: f32[2,32], index: 2, kind: output, shape index: {}]  }
   0x1   :  { %v26_v0 = vld [vmem:[%s666_s1] sm:$0xff]  ;;  %v27_v1 = vld [vmem:[%s666_s1 + $0x8] sm:$0xff]  ;;  %v28_v2 = vld [vmem:[%s666_s1 + $0x10] sm:$0xff]  ;;  %18 = vst.msk [vmem:[#allocation2 + $0x1] sm:$0x1] %vm16_vm1, %v568_v6  ;;  %506 = vmatprep.subr.mxu1 %v569_v8 }
   0x2   :  { %v516_v3 = vpack.c.bf16 %v27_v1, %v26_v0  ;;  %v29_v4 = vld [vmem:[%s666_s1 + $0x18] sm:$0xff]  ;;  %v24_v5 = vld [vmem:[%s665_s0] sm:$0xff]  ;;  %17 = vst.msk [vmem:[#allocation2] sm:$0x1] %vm16_vm1, %v568_v6  ;;  %20 = vst.msk [vmem:[#allocation3 + $0x1] sm:$0x1] %vm16_vm1, %v569_v8 }
   0x3   :  { %v520_v7 = vpack.c.bf16 %v29_v4, %v28_v2  ;;  %503 = vmatprep.mubr.msk.f32.mxu0 %vm30_vm0, %v24_v5  ;;  %19 = vst.msk [vmem:[#allocation3] sm:$0x1] %vm16_vm1, %v569_v8 }
   0x4   :  { %7 = vsyncpa [#allocation6], 0  ;;  %517 = vmatprep.subr.bf16.mxu0 %v516_v3  ;;  %507 = vmatpush3.msra.mxu1 %v24_v5  ;;  %v616_v9 = vld [vmem:[%s665_s0 + $0x8] sm:$0xff]  ;;  %v570_v10 = vmov 0   ;;  %vm114_vm2 = vcmask 7168   ;;  %v139_v18 = vlaneseq  ;;  %vm21_vm3 = vcmask 253952  }
   0x5   :  { %519 = vmatpush3.bf16.msra.mxu0 %v516_v3  ;;  %511 = vmatprep.subr.mxu1 %v569_v8  ;;  %22 = vst.msk [vmem:[#allocation4] sm:$0x1] %vm21_vm3, %v569_v8  ;;  %23 = vst.msk [vmem:[#allocation4 + $0x1] sm:$0x1] %vm21_vm3, %v569_v8  ;;  %vm571_vm4 = vmmov 0   ;;  %vm210_vm5 = vcmask 64512  }
   0x6   :  { %521 = vmatprep.subr.bf16.mxu0 %v520_v7  ;;  %530 = vset.pattern.permute.xlu1 %v570_v10  ;;  %v623_v23 = vshrl.u32 %v139_v18, 7  ;;  %s573_s0 = smov [#allocation5]   ;;  %vm465_vm6 = vcmask 254976  }
   0x7   :  { %508 = vmatprep.mubr.msk.f32.mxu1 %vm571_vm4, %v569_v8  ;;  %s473_s20 = sshll.u32 %s573_s0, 4  ;;  %s474_s20 = int_to_ptr.vmem [resolvable:$true] %s473_s20 }
   0x8   :  { %v113_v26 = vld [vmem:[#allocation2 + $0x1] sm:$0x1]  ;;  %v626_v29 = vsub.s32 0, %v623_v23  ;;  %s544_s21 = scalar_lea.vmem %s474_s20, 32  ;;  %p549_p1 = scmp.lt.s32.totalorder %s474_s20, %s474_s20 }
   0x9   :  { %523 = vmatpush3.bf16.msra.mxu0 %v520_v7  ;;  %v112_v30 = vld [vmem:[#allocation2] sm:$0x1]  ;;  %v156_v57 = vld [vmem:[#allocation3 + $0x1] sm:$0x1]  ;;  %p545_p0 = scmp.ne.s32.totalorder %s474_s20, %s544_s21  ;;  %p550_p2 = scmp.lt.s32.totalorder %s544_s21, %s544_s21 }
   0xa   :  { %v155_v60 = vld [vmem:[#allocation3] sm:$0x1] }
   0xb   :  { %p551_p3 = por %p550_p2, %p549_p1 }
   0xc   :  { %504 = vmatmul.mubr.msk.f32.vlgmr.msra.gmra.mrb[0].mxu0 %vm30_vm0, %v616_v9 }
   0xd   :  { %p552_p4 = pnand %p551_p3, %p545_p0 }
  0xdf   :  { %v505_v11 = vpop.f32.mrb[0].mxu0 }
  0xe0   :  { %v122_v12 = vsel %vm114_vm2, %v505_v11, -inf  ;;  %v103_v13 = vpop.f32.mrb[1].mxu0 }
  0xe1   :  { %v123_v14 = vrot.slane %v122_v12, 4  ;;  %v115_v15 = vsel %vm114_vm2, %v103_v13, -inf }
  0xe2   :  { %v116_v16 = vrot.slane %v115_v15, 4 }
  0xe3   :  { %v124_v17 = vmax.f32 %v122_v12, %v123_v14 }
  0xe4   :  { %v117_v19 = vmax.f32 %v115_v15, %v116_v16  ;;  %v389_v16 = vld [vmem:[#allocation4] sm:$0x1] }
  0xe5   :  { %v125_v20 = vrot.slane %v124_v17, 2 }
  0xe6   :  { %v118_v21 = vrot.slane %v117_v19, 2 }
  0xe7   :  { %v126_v22 = vmax.f32 %v124_v17, %v125_v20 }
  0xe8   :  { %v119_v24 = vmax.f32 %v117_v19, %v118_v21  ;;  %v390_v19 = vld [vmem:[#allocation4 + $0x1] sm:$0x1] }
  0xe9   :  { %v127_v25 = vrot.slane %v126_v22, 1 }
  0xea   :  { %v120_v27 = vrot.slane %v119_v24, 1 }
  0xeb   :  { %v128_v28 = vmax.f32 %v126_v22, %v127_v25  ;;  %v572_v25 = vmov 1966171168  }
  0xec   :  { %v121_v31 = vmax.f32 %v119_v24, %v120_v27 }
  0xed   :  { %v130_v32 = vmax.f32 %v113_v26, %v128_v28 }
  0xee   :  { %v129_v33 = vmax.f32 %v112_v30, %v121_v31 }
  0xef   :  { %v146_v34 = vrot.slane %v130_v32, %v626_v29  ;;  %417 = vst.msk [vmem:[#allocation2 + $0x1] sm:$0x1] %vm16_vm1, %v130_v32  ;;  %v132_v35 = vsub.f32 %v113_v26, %v130_v32  ;;  %v451_v26 = vunpack.c.l.s4 %v572_v25 }
  0xf0   :  { %v142_v36 = vrot.slane %v129_v33, %v626_v29  ;;  %416 = vst.msk [vmem:[#allocation2] sm:$0x1] %vm16_vm1, %v129_v33  ;;  %v131_v37 = vsub.f32 %v112_v30, %v129_v33 }
  0xf1   :  { %v150_v38 = vsub.f32 %v505_v11, %v146_v34  ;;  %v135_v42 = vmul.f32 1.442695, %v132_v35  ;;  %v452_v30 = vunpack.c.0.s8 %v451_v26 }
  0xf2   :  { %v149_v39 = vsub.f32 %v103_v13, %v142_v36  ;;  %v133_v40 = vmul.f32 1.442695, %v131_v37 }
  0xf3   :  { %v153_v41 = vmul.f32 1.442695, %v150_v38  ;;  %v455_v37 = vsub.s32 %v452_v30, %v623_v23 }
  0xf4   :  { %v151_v43 = vmul.f32 1.442695, %v149_v39  ;;  %532 = vpow2.f32 %v133_v40 }
  0xf5   :  { %534 = vpow2.f32 %v153_v41 }
  0xf6   :  { %536 = vpow2.f32 %v151_v43 }
  0xf7   :  { %538 = vpow2.f32 %v135_v42 }
  0xfe   :  { %v533_v44 = vpop.eup %532 }
  0xff   :  { %v535_v45 = vpop.eup %534  ;;  %393 = vperm.xlu1 %530, %v533_v44   ;;  %v157_v1 = vmul.f32 %v533_v44, %v155_v60 }
 0x100   :  { %v537_v46 = vpop.eup %536  ;;  %v166_v47 = vsel %vm114_vm2, %v535_v45, 0.0 }
 0x101   :  { %v167_v48 = vrot.slane %v166_v47, 4  ;;  %v159_v49 = vsel %vm114_vm2, %v537_v46, 0.0  ;;  %178 = vxpose.xlu0.b32.start.end [1/1] (short) (narrow) %v537_v46, 8  ;;  %v539_v50 = vpop.eup %538 }
 0x102   :  { %v160_v51 = vrot.slane %v159_v49, 4  ;;  %v158_v62 = vmul.f32 %v539_v50, %v156_v57 }
 0x103   :  { %v168_v52 = vadd.f32 %v167_v48, %v166_v47  ;;  %402 = vperm.xlu1 %530, %v539_v50  }
 0x104   :  { %v161_v53 = vadd.f32 %v160_v51, %v159_v49 }
 0x105   :  { %v169_v54 = vrot.slane %v168_v52, 2  ;;  %284 = vxpose.xlu0.b32.start.end [1/1] (short) (narrow) %v535_v45, 8 }
 0x106   :  { %v162_v55 = vrot.slane %v161_v53, 2 }
 0x107   :  { %v170_v56 = vadd.f32 %v169_v54, %v168_v52 }
 0x108   :  { %v163_v58 = vadd.f32 %v162_v55, %v161_v53 }
 0x109   :  { %v171_v59 = vrot.slane %v170_v56, 1 }
 0x10a   :  { %v164_v61 = vrot.slane %v163_v58, 1 }
 0x10b   :  { %v172_v63 = vadd.f32 %v171_v59, %v170_v56 }
 0x10c   :  { %v165_v0 = vadd.f32 %v164_v61, %v163_v58 }
 0x10d   :  { %v174_v2 = vadd.f32 %v172_v63, %v158_v62 }
 0x10e   :  { %v173_v3 = vadd.f32 %v165_v0, %v157_v1 }
 0x10f   :  { %177 = vst.msk [vmem:[#allocation3 + $0x1] sm:$0x1] %vm16_vm1, %v174_v2 }
 0x110   :  { %176 = vst.msk [vmem:[#allocation3] sm:$0x1] %vm16_vm1, %v173_v3 }
 0x116   :  { %v422_v4 = vld [vmem:[#allocation3 + $0x1] sm:$0x1] }
 0x117   :  { %540 = vrcp.f32 %v422_v4  ;;  %v421_v6 = vld [vmem:[#allocation3] sm:$0x1] }
 0x118   :  { %542 = vrcp.f32 %v421_v6 }
 0x121   :  { %v541_v5 = vpop.eup %540 }
 0x122   :  { %438 = vperm.xlu1 %530, %v541_v5   ;;  %v543_v7 = vpop.eup %542 }
 0x12e   :  { %531 = vset.pattern.permute.xlu0 %v570_v10 }
 0x12f   :  { %429 = vperm.xlu0 %531, %v543_v7  }
 0x17e   :  { %v394_v13 = vpop.permute.xlu1 %393 }
 0x17f   :  { %v399_v14 = vrot.slane %v394_v13, %v626_v29 }
 0x181   :  { %v194_v11 = vpop.trf.xlu0  ;;  %v409_v18 = vmul.f32 %v399_v14, %v389_v16 }
 0x182   :  { %509 = vmatmul.mubr.msk.f32.vlgmr.msra.gmra.mrb[0].mxu1 %vm210_vm5, %v194_v11  ;;  %v403_v15 = vpop.permute.xlu1 %402 }
 0x183   :  { %512 = vmatpush3.msra.mxu1 %v616_v9  ;;  %513 = vmatprep.mubr.msk.f32.mxu1 %vm571_vm4, %v569_v8  ;;  %v408_v17 = vrot.slane %v403_v15, %v626_v29 }
 0x185   :  { %v300_v12 = vpop.trf.xlu0  ;;  %v410_v9 = vmul.f32 %v408_v17, %v390_v19 }
 0x186   :  { %514 = vmatmul.mubr.msk.f32.vlgmr.msra.gmra.mrb[2].mxu1 %vm210_vm5, %v300_v12 }
 0x1a1   :  { %v439_v27 = vpop.permute.xlu1 %438 }
 0x1a2   :  { %v444_v32 = vrot.slane %v439_v27, %v626_v29 }
 0x1ae   :  { %v430_v28 = vpop.permute.xlu0 %429 }
 0x1af   :  { %v435_v33 = vrot.slane %v430_v28, %v626_v29 }
 0x255   :  { %v280_v10 = vpop.f32.mrb[0].mxu1 }
 0x256   :  { %v411_v20 = vadd.f32 %v409_v18, %v280_v10  ;;  %v510_v21 = vpop.f32.mrb[1].mxu1 }
 0x258   :  { %414 = vst.msk [vmem:[#allocation4] sm:$0x1] %vm21_vm3, %v411_v20 }
 0x259   :  { %v385_v22 = vpop.f32.mrb[2].mxu1 }
 0x25a   :  { %v412_v24 = vadd.f32 %v410_v9, %v385_v22  ;;  %v515_v8 = vpop.f32.mrb[3].mxu1 }
 0x25c   :  { %415 = vst.msk [vmem:[#allocation4 + $0x1] sm:$0x1] %vm21_vm3, %v412_v24 }
 0x25f   :  { %v425_v31 = vld [vmem:[#allocation4] sm:$0x1] }
 0x260   :  { %v445_v35 = vmul.f32 %v435_v33, %v425_v31 }
 0x263   :  { %v426_v34 = vld [vmem:[#allocation4 + $0x1] sm:$0x1] }
 0x264   :  { %v446_v36 = vmul.f32 %v444_v32, %v426_v34 }
 0x266   :  { %v449_v38 = vcombine.low %v445_v35, %v446_v36 }
 0x268   :  { %v456_v39 = vrot.slane %v449_v38, %v455_v37 }
 0x26a   :  { %v463_v40 = vrot.slane %v456_v39, %v455_v37 }
 0x26c   :  { %466 = vst.msk [vmem:[#allocation5] sm:$0x3] %vm465_vm6, %v463_v40 }
 0x26d   :  { %555 = shalt.err (!%p552_p4)
}
 0x26e   :  { %s556_s24 = scalar_lea.hbm %s667_s2, 32 }
 0x26f   :  { %p557_p5 = scmp.ne.s32.totalorder %s667_s2, %s556_s24  ;;  %p560_p6 = scmp.lt.u32.totalorder %s556_s24, %s667_s2 }
 0x271   :  { %p562_p7 = pnand %p560_p6, %p557_p5 }
 0x273   :  { %565 = shalt.err (!%p562_p7)
}
 0x274   :  { %476 = dma.vmem_to_hbm [thread:$0]  %s474_s20, 32, %s667_s2, [#allocation6]  }
 0x275   :  { %566 = dma.done.wait [#allocation6], 32  }
 0x276   :  { %567 = vsyncadd [#allocation6], 4294967264 }
 0x277   :  { %480 = vsyncpa [#allocation6], 1 }

</bundles_post_ra>
